<compile_context>
chip_gen: v7x
topology: tpu7x:2x2x1
jax: 0.10.0
libtpu: 0.0.40
codegen_flags: <defaults>
</compile_context>

<pallas_src>
import jax
import jax.numpy as jnp
from jax.experimental import pallas as pl
from jax.experimental.pallas import tpu as pltpu

_LANES = 128
# Below this the kernel is pure launch overhead for a semantic no-op: bypass.
_BYPASS_BYTES = 1 << 20  # 1 MiB


def _identity_kernel(x_ref, o_ref):
    # Pure pass-through: the only "compute" consistent with the empty module.
    # No extra elementwise work — keeps the vst slot free (matters on v5e).
    o_ref[...] = x_ref[...]


def _vmem_capacity_bytes():
    """Physical VMEM of the current chip, with a conservative fallback."""
    try:
        return int(pltpu.get_tpu_info().vmem_capacity_bytes)
    except Exception:
        return 64 << 20  # v7x-sized fallback (smallest of the three)


def _max_tile_bytes():
    # Budget 4 live tile buffers (double-buffered in + out) against ~1/4 of
    # physical VMEM: 4 MiB tiles on v7x (64 MiB), 8 MiB on v5e/v6e (128 MiB).
    return max(1 << 20, _vmem_capacity_bytes() // 16)


def _vmem_limit_bytes(tile_bytes):
    # Cover 4 live buffers with 2x headroom, never more than half of physical
    # VMEM (v5e's 16 MiB default scoped limit would otherwise be too tight).
    return int(min(_vmem_capacity_bytes() // 2, max(8 * tile_bytes, 16 << 20)))


def _sublane_multiple(dtype):
    # Sub-32-bit dtypes pack along sublanes: 8 for 4-byte, 16 for 2-byte,
    # 32 for 1-byte (int8/fp8).
    itemsize = jnp.dtype(dtype).itemsize
    if itemsize >= 4:
        return 8
    return 8 * (4 // itemsize)


def _choose_lane_width(padded_total):
    # Widest last dim (multiple of the 128-lane vreg width) that divides the
    # flattened size -> longer contiguous DMAs, always unmasked vst.
    for lanes in (2048, 1024, 512, 256, _LANES):
        if padded_total % lanes == 0 and padded_total // lanes >= 8:
            return lanes
    return _LANES


def _choose_row_tile(rows, lanes, dtype):
    itemsize = jnp.dtype(dtype).itemsize
    sub = _sublane_multiple(dtype)
    cap_bytes = _max_tile_bytes()
    cap_rows = max(sub, (cap_bytes // (lanes * itemsize)) // sub * sub)
    if rows <= 2 * sub:
        # Tiny array: a single full-array block (exempt from the sublane
        # divisibility rule because it equals the full dim).
        return rows
    # Guarantee >= 2 grid steps so v7x's two TensorCores both get work under
    # dimension_semantics=("parallel",); still respect the VMEM-derived cap.
    half = -(-rows // 2)              # cdiv(rows, 2)
    half = -(-half // sub) * sub      # round up to the sublane multiple
    return max(sub, min(cap_rows, half))


def pallas_identity(x, *, force_kernel=False):
    """Lane-dense, VMEM-budgeted Pallas identity copy of `x`.

    For small inputs (the module's real workload) this returns `x` directly —
    launching a copy kernel for a no-op would be pure overhead.  Pass
    `force_kernel=True` to exercise the Pallas path regardless of size.
    """
    orig_shape, orig_dtype = x.shape, x.dtype
    itemsize = jnp.dtype(orig_dtype).itemsize
    total = x.size

    if not force_kernel and total * itemsize < _BYPASS_BYTES:
        return x  # identity: nothing to compute, nothing to launch

    # Flatten to a lane-dense 2-D slab; pad to a multiple of 128 if needed.
    flat = jnp.ravel(x)
    pad = (-total) % _LANES
    if pad:
        flat = jnp.pad(flat, (0, pad))
    padded_total = total + pad

    lanes = _choose_lane_width(padded_total)
    rows = padded_total // lanes
    x2d = jnp.reshape(flat, (rows, lanes))

    row_tile = _choose_row_tile(rows, lanes, orig_dtype)
    grid = (pl.cdiv(rows, row_tile),)
    tile_bytes = row_tile * lanes * itemsize

    y2d = pl.pallas_call(
        _identity_kernel,
        out_shape=jax.ShapeDtypeStruct((rows, lanes), orig_dtype),
        grid=grid,
        in_specs=[
            pl.BlockSpec(
                (row_tile, lanes),
                lambda i: (i, 0),
                memory_space=pltpu.MemorySpace.VMEM,
            )
        ],
        out_specs=pl.BlockSpec(
            (row_tile, lanes),
            lambda i: (i, 0),
            memory_space=pltpu.MemorySpace.VMEM,
        ),
        # Memory-only kernel: tell XLA so it can schedule neighbours around it.
        cost_estimate=pl.CostEstimate(
            flops=0,
            transcendentals=0,
            bytes_accessed=2 * padded_total * itemsize,
        ),
        compiler_params=pltpu.CompilerParams(
            dimension_semantics=("parallel",),
            vmem_limit_bytes=_vmem_limit_bytes(tile_bytes),
        ),
    )(x2d)

    y_flat = jnp.reshape(y2d, (padded_total,))
    if pad:
        y_flat = y_flat[:total]
    return jnp.reshape(y_flat, orig_shape)


class ExprEvalNetwork:
    """JAX/Pallas mirror of the (empty) PyTorch module."""

    def __init__(self):
        # The PyTorch __init__ defines no parameters.
        pass

    def forward(self, x):
        # Exact semantics of the reference: body is `pass`, returns None.
        return None

    def __call__(self, x):
        return self.forward(x)


if __name__ == "__main__":
    key = jax.random.PRNGKey(0)
    # Small NCHW input consistent with a typical conv-style module signature.
    x = jax.random.normal(key, (2, 4, 16, 16), dtype=jnp.float32)

    # 1) Bypass path: tiny input -> no kernel launch, x returned as-is.
    y_fast = pallas_identity(x)
    assert y_fast is x

    # 2) Forced Pallas path on the small module input (single full block).
    y = pallas_identity(x, force_kernel=True)
    jax.block_until_ready(y)
    assert y.shape == x.shape and y.dtype == x.dtype
    assert bool(jnp.allclose(y, x))

    # 3) Larger lane-dense demo (2 MiB) -> >= 2 grid steps so both v7x
    #    TensorCores get work; exercises the tiled path end to end.
    xl = jax.random.normal(jax.random.PRNGKey(1), (512, 1024), dtype=jnp.float32)
    yl = pallas_identity(xl)
    jax.block_until_ready(yl)
    assert yl.shape == xl.shape and yl.dtype == xl.dtype
    assert bool(jnp.allclose(yl, xl))

    # Exact module semantics: forward body is `pass`, returns None.
    net = ExprEvalNetwork()
    out = net(x)
    assert out is None

    print("KERNEL_OK")
</pallas_src>

<mosaic_0001>
module attributes {stable_mosaic.version = 11 : i64} {
  func.func @_identity_kernel(%arg0: i32, %arg1: memref<8x256xf32, #tpu.memory_space<vmem>>, %arg2: memref<8x256xf32, #tpu.memory_space<vmem>>) attributes {dimension_semantics = [#tpu.dimension_semantics<parallel>], iteration_bounds = array<i64: 1>, scalar_prefetch = 0 : i64, scratch_operands = 0 : i64, tpu.core_type = #tpu.core_type<tc>, window_params = [{transform_indices = @transform_0, window_bounds = array<i64: 8, 256>}, {transform_indices = @transform_1, window_bounds = array<i64: 8, 256>}]} {
    %c0 = arith.constant 0 : index
    %c0_0 = arith.constant 0 : index
    %0 = vector.load %arg1[%c0, %c0_0] : memref<8x256xf32, #tpu.memory_space<vmem>>, vector<8x256xf32>
    %c0_1 = arith.constant 0 : index
    %c0_2 = arith.constant 0 : index
    %1 = vector.load %arg2[%c0_1, %c0_2] : memref<8x256xf32, #tpu.memory_space<vmem>>, vector<8x256xf32>
    tpu.vector_store %arg2[%c0_1, %c0_2], %0 {strides = array<i32>} : memref<8x256xf32, #tpu.memory_space<vmem>>, vector<8x256xf32>,
    return
  }
  func.func @transform_0(%arg0: i32) -> (i32, i32) {
    %c0_i32 = arith.constant 0 : i32
    %c0_i32_0 = arith.constant 0 : i32
    return %arg0, %c0_i32 : i32, i32
  }
  func.func @transform_1(%arg0: i32) -> (i32, i32) {
    %c0_i32 = arith.constant 0 : i32
    %c0_i32_0 = arith.constant 0 : i32
    return %arg0, %c0_i32 : i32, i32
  }
}

</mosaic_0001>

<bundles_post_ra>
// kernel: tpu_custom_call.1
= control target key start
LH: loop header
LB: loop body
LE: loop exit
PB: predicated region body
PF: predicated region fallthrough
CT: control target
= control target key end

     0   :  { %6 = vsyncpa [#allocation3], 0  ;;  %s126_s0 = inlined_call_operand.hbm [shape: f32[8,256], index: 0, kind: input, shape index: {}]   ;;  %s127_s1 = inlined_call_operand.hbm [shape: f32[8,256], index: 1, kind: output, shape index: {}]  }
   0x1   :  { %7 = vsyncpa [#allocation4], 0  ;;  %s90_s6 = smov [#allocation2]   ;;  %s42_s10 = scalar_lea.hbm %s126_s0, 256 }
   0x2   :  { %s14_s7 = sshll.u32 %s90_s6, 4  ;;  %p43_p0 = scmp.ne.s32.totalorder %s126_s0, %s42_s10  ;;  %s15_s7 = int_to_ptr.vmem [resolvable:$true] %s14_s7 }
   0x3   :  { %p46_p1 = scmp.lt.u32.totalorder %s42_s10, %s126_s0 }
   0x5   :  { %p48_p2 = pnand %p46_p1, %p43_p0 }
   0x7   :  { %51 = shalt.err (!%p48_p2)
}
   0x8   :  { %s52_s15 = scalar_lea.vmem %s15_s7, 256  ;;  %p57_p4 = scmp.lt.s32.totalorder %s15_s7, %s15_s7 }
   0x9   :  { %p53_p3 = scmp.ne.s32.totalorder %s15_s7, %s52_s15  ;;  %p58_p5 = scmp.lt.s32.totalorder %s52_s15, %s52_s15 }
   0xb   :  { %p59_p6 = por %p58_p5, %p57_p4 }
   0xd   :  { %p60_p7 = pnand %p59_p6, %p53_p3 }
   0xf   :  { %63 = shalt.err (!%p60_p7)
}
  0x10   :  { %17 = dma.hbm_to_vmem [thread:$0]  %s126_s0, 256, %s15_s7, [#allocation3]  }
  0x11   :  { %86 = dma.done.wait [#allocation3], 256  }
  0x12   :  { %87 = vsyncadd [#allocation3], 4294967040  ;;  %s91_s18 = smov [#allocation5]   ;;  %v21_v0 = vld [vmem:[#allocation2] sm:$0xff]  ;;  %v22_v1 = vld [vmem:[#allocation2 + $0x8] sm:$0xff] }
  0x13   :  { %s31_s19 = sshll.u32 %s91_s18, 4  ;;  %23 = vst [vmem:[#allocation5] sm:$0xff] %v21_v0  ;;  %24 = vst [vmem:[#allocation5 + $0x8] sm:$0xff] %v22_v1  ;;  %s32_s19 = int_to_ptr.vmem [resolvable:$true] %s31_s19 }
  0x14   :  { %s64_s20 = scalar_lea.vmem %s32_s19, 256  ;;  %p69_p9 = scmp.lt.s32.totalorder %s32_s19, %s32_s19 }
  0x15   :  { %p65_p8 = scmp.ne.s32.totalorder %s32_s19, %s64_s20  ;;  %p70_p10 = scmp.lt.s32.totalorder %s64_s20, %s64_s20 }
  0x17   :  { %p71_p11 = por %p70_p10, %p69_p9 }
  0x19   :  { %p72_p12 = pnand %p71_p11, %p65_p8 }
  0x1b   :  { %75 = shalt.err (!%p72_p12)
}
  0x1c   :  { %s76_s0 = scalar_lea.hbm %s127_s1, 256 }
  0x1d   :  { %p77_p13 = scmp.ne.s32.totalorder %s127_s1, %s76_s0  ;;  %p80_p0 = scmp.lt.u32.totalorder %s76_s0, %s127_s1 }
  0x1f   :  { %p82_p1 = pnand %p80_p0, %p77_p13 }
  0x21   :  { %85 = shalt.err (!%p82_p1)
}
  0x22   :  { %34 = dma.vmem_to_hbm [thread:$0]  %s32_s19, 256, %s127_s1, [#allocation4]  }
  0x23   :  { %88 = dma.done.wait [#allocation4], 256  }
  0x24   :  { %89 = vsyncadd [#allocation4], 4294967040 }
  0x25   :  { %38 = vsyncpa [#allocation3], 1 }
  0x26   :  { %39 = vsyncpa [#allocation4], 1 }

</bundles_post_ra>
